<compile_context>
chip_gen: v7x
topology: tpu7x:2x2x1
jax: 0.10.0
libtpu: 0.0.40
codegen_flags: <defaults>
</compile_context>

<pallas_src>
import numpy as np
import jax
import jax.numpy as jnp
from jax.experimental import pallas as pl
from jax.experimental.pallas import tpu as pltpu

# ---------------- config (small, consistent with the module) ----------------
B = 2          # batch
S = 8          # seq_len
HIDDEN = 64    # config.hidden_size
INTER = 128    # config.intermediate_size
# config.mlp_bias = False (Llama default) -> no bias terms.


# ---------------- fused SwiGLU MLP kernel ----------------
def swiglu_mlp_kernel(x_ref, wg_ref, wu_ref, wd_ref, o_ref, acc_ref):
    """Grid = (row_tiles [parallel], inter_tiles [arbitrary, contraction])."""
    j = pl.program_id(1)

    @pl.when(j == 0)
    def _init():
        acc_ref[...] = jnp.zeros_like(acc_ref)

    x = x_ref[...]                                                     # (tm, HIDDEN) bf16

    # gate / up projections for THIS inter-tile: bf16 operands, f32 accumulation.
    g = jnp.dot(x, wg_ref[...], preferred_element_type=jnp.float32)   # (tm, tn) f32
    u = jnp.dot(x, wu_ref[...], preferred_element_type=jnp.float32)   # (tm, tn) f32

    # SiLU(g) * u in f32 (sigmoid -> EUP; keep f32 for v5e), bf16 for the MXU.
    act = (g * jax.nn.sigmoid(g) * u).astype(jnp.bfloat16)            # (tm, tn)

    # down projection: accumulate this inter-tile's contribution.
    acc_ref[...] += jnp.dot(act, wd_ref[...],
                            preferred_element_type=jnp.float32)       # (tm, HIDDEN)

    @pl.when(j == pl.num_programs(1) - 1)
    def _finalize():
        o_ref[...] = acc_ref[...].astype(o_ref.dtype)


# ---------------- wrapper ----------------
def llama_mlp(x, params, *, tile_rows=None, tile_inter=None):
    """x: (..., HIDDEN). Batch/seq dims are folded into the sublane (row) axis."""
    wg = params["wg_t"]            # (HIDDEN, INTER) bf16
    wu = params["wu_t"]            # (HIDDEN, INTER) bf16
    wd = params["wd_t"]            # (INTER, HIDDEN) bf16

    orig_shape = x.shape
    out_dtype = x.dtype
    rows = int(np.prod(orig_shape[:-1]))
    x2 = x.reshape(rows, HIDDEN).astype(jnp.bfloat16)

    tm = rows if tile_rows is None else tile_rows
    tn = INTER if tile_inter is None else tile_inter
    assert rows % tm == 0, "row tile must divide total rows"
    assert tm == rows or tm % 8 == 0, "row tile must be sublane-aligned"
    assert INTER % tn == 0 and (tn == INTER or tn % 128 == 0), \
        "inter tile must be lane-aligned and divide INTER"

    # VMEM budget estimate (double-buffered inputs + f32 accumulator + temporaries).
    est = (2 * tm * HIDDEN * 2            # x tiles (bf16)
           + 2 * 2 * HIDDEN * tn * 2      # wg + wu tiles (bf16)
           + 2 * tn * HIDDEN * 2          # wd tiles (bf16)
           + 2 * tm * HIDDEN * 4          # output tiles (f32)
           + tm * HIDDEN * 4              # accumulator (f32)
           + 3 * tm * tn * 4)             # g / u / act temporaries
    vmem_limit = int(min(100 << 20, max(32 << 20, 2 * est)))

    out = pl.pallas_call(
        swiglu_mlp_kernel,
        out_shape=jax.ShapeDtypeStruct((rows, HIDDEN), out_dtype),
        grid=(rows // tm, INTER // tn),
        in_specs=[
            pl.BlockSpec((tm, HIDDEN), lambda i, j: (i, 0)),   # activations: row tiles
            pl.BlockSpec((HIDDEN, tn), lambda i, j: (0, j)),   # gate weight: N tiles
            pl.BlockSpec((HIDDEN, tn), lambda i, j: (0, j)),   # up weight:   N tiles
            pl.BlockSpec((tn, HIDDEN), lambda i, j: (j, 0)),   # down weight: K tiles
        ],
        out_specs=pl.BlockSpec((tm, HIDDEN), lambda i, j: (i, 0)),
        scratch_shapes=[pltpu.VMEM((tm, HIDDEN), jnp.float32)],
        compiler_params=pltpu.CompilerParams(
            dimension_semantics=("parallel", "arbitrary"),
            vmem_limit_bytes=vmem_limit),
    )(x2, wg, wu, wd)
    return out.reshape(orig_shape)


# ---------------- deterministic parameter setup ----------------
def make_params():
    key = jax.random.PRNGKey(0)
    k_g, k_u, k_d = jax.random.split(key, 3)
    sc = 0.05
    # PyTorch nn.Linear weights are (out_features, in_features)
    wg = sc * jax.random.normal(k_g, (INTER, HIDDEN), jnp.float32)   # gate_proj.weight
    wu = sc * jax.random.normal(k_u, (INTER, HIDDEN), jnp.float32)   # up_proj.weight
    wd = sc * jax.random.normal(k_d, (HIDDEN, INTER), jnp.float32)   # down_proj.weight

    return {
        # f32 copies for the reference
        "wg_f32": wg.T, "wu_f32": wu.T, "wd_f32": wd.T,
        # (in, out) layout, bf16 storage -> half the weight HBM bytes / VMEM footprint
        "wg_t": wg.T.astype(jnp.bfloat16),
        "wu_t": wu.T.astype(jnp.bfloat16),
        "wd_t": wd.T.astype(jnp.bfloat16),
    }


# ---------------- pure-JAX f32 reference (mirrors the PyTorch forward) ----------------
def ref_forward(x, p):
    g = x @ p["wg_f32"]
    u = x @ p["wu_f32"]
    return (jax.nn.silu(g) * u) @ p["wd_f32"]


if __name__ == "__main__":
    params = make_params()
    x = jax.random.normal(jax.random.PRNGKey(0), (B, S, HIDDEN), jnp.float32)

    y = llama_mlp(x, params)
    y = jax.block_until_ready(y)

    y_ref = jax.block_until_ready(ref_forward(x, params))
    assert y.shape == (B, S, HIDDEN)
    err = np.max(np.abs(np.asarray(y, dtype=np.float32) - np.asarray(y_ref)))
    # bf16 operands -> loosened tolerance vs the f32 reference
    assert np.allclose(np.asarray(y, dtype=np.float32), np.asarray(y_ref),
                       atol=2e-2, rtol=2e-2), f"mismatch vs reference: max abs err {err}"
    print("KERNEL_OK")
</pallas_src>

<mosaic_0001>
module attributes {stable_mosaic.version = 11 : i64} {
  func.func @swiglu_mlp_kernel(%arg0: i32, %arg1: i32, %arg2: memref<16x64xbf16, #tpu.memory_space<vmem>>, %arg3: memref<64x128xbf16, #tpu.memory_space<vmem>>, %arg4: memref<64x128xbf16, #tpu.memory_space<vmem>>, %arg5: memref<128x64xbf16, #tpu.memory_space<vmem>>, %arg6: memref<16x64xf32, #tpu.memory_space<vmem>>, %arg7: memref<16x64xf32, #tpu.memory_space<vmem>>) attributes {dimension_semantics = [#tpu.dimension_semantics<parallel>, #tpu.dimension_semantics<arbitrary>], iteration_bounds = array<i64: 1, 1>, scalar_prefetch = 0 : i64, scratch_operands = 1 : i64, tpu.core_type = #tpu.core_type<tc>, window_params = [{transform_indices = @transform_0, window_bounds = array<i64: 16, 64>}, {transform_indices = @transform_1, window_bounds = array<i64: 64, 128>}, {transform_indices = @transform_2, window_bounds = array<i64: 64, 128>}, {transform_indices = @transform_3, window_bounds = array<i64: 128, 64>}, {transform_indices = @transform_4, window_bounds = array<i64: 16, 64>}]} {
    %c0_i32 = arith.constant 0 : i32
    %0 = arith.cmpi eq, %arg1, %c0_i32 : i32
    %1 = arith.extui %0 : i1 to i32
    %c0_i32_0 = arith.constant 0 : i32
    %2 = arith.cmpi ne, %1, %c0_i32_0 : i32
    scf.if %2 {
      %cst_17 = arith.constant 0.000000e+00 : f32
      %24 = vector.broadcast %cst_17 : f32 to vector<16x64xf32>
      %c0_18 = arith.constant 0 : index
      %c0_19 = arith.constant 0 : index
      %25 = vector.load %arg7[%c0_18, %c0_19] : memref<16x64xf32, #tpu.memory_space<vmem>>, vector<16x64xf32>
      tpu.vector_store %arg7[%c0_18, %c0_19], %24 {strides = array<i32>} : memref<16x64xf32, #tpu.memory_space<vmem>>, vector<16x64xf32>,
    } else {
    }
    %c0 = arith.constant 0 : index
    %c0_1 = arith.constant 0 : index
    %3 = vector.load %arg2[%c0, %c0_1] : memref<16x64xbf16, #tpu.memory_space<vmem>>, vector<16x64xbf16>
    %c0_2 = arith.constant 0 : index
    %c0_3 = arith.constant 0 : index
    %4 = vector.load %arg3[%c0_2, %c0_3] : memref<64x128xbf16, #tpu.memory_space<vmem>>, vector<64x128xbf16>
    %cst = arith.constant dense<0.000000e+00> : vector<16x128xf32>
    %5 = tpu.matmul %3, %4, %cst {dimension_numbers = #tpu.dot_dimension_numbers<[1], [0], [0], [1], [0, 0, 1, 1], [], []>} : vector<16x64xbf16>, vector<64x128xbf16>, vector<16x128xf32> -> vector<16x128xf32>
    %c0_4 = arith.constant 0 : index
    %c0_5 = arith.constant 0 : index
    %6 = vector.load %arg4[%c0_4, %c0_5] : memref<64x128xbf16, #tpu.memory_space<vmem>>, vector<64x128xbf16>
    %cst_6 = arith.constant dense<0.000000e+00> : vector<16x128xf32>
    %7 = tpu.matmul %3, %6, %cst_6 {dimension_numbers = #tpu.dot_dimension_numbers<[1], [0], [0], [1], [0, 0, 1, 1], [], []>} : vector<16x64xbf16>, vector<64x128xbf16>, vector<16x128xf32> -> vector<16x128xf32>
    %8 = arith.negf %5 : vector<16x128xf32>
    %9 = math.exp %8 : vector<16x128xf32>
    %cst_7 = arith.constant 1.000000e+00 : f32
    %10 = vector.broadcast %cst_7 : f32 to vector<16x128xf32>
    %11 = arith.addf %10, %9 : vector<16x128xf32>
    %12 = arith.divf %10, %11 : vector<16x128xf32>
    %13 = arith.mulf %5, %12 : vector<16x128xf32>
    %14 = arith.mulf %13, %7 : vector<16x128xf32>
    %15 = arith.truncf %14 : vector<16x128xf32> to vector<16x128xbf16>
    %c0_8 = arith.constant 0 : index
    %c0_9 = arith.constant 0 : index
    %16 = vector.load %arg7[%c0_8, %c0_9] : memref<16x64xf32, #tpu.memory_space<vmem>>, vector<16x64xf32>
    %c0_10 = arith.constant 0 : index
    %c0_11 = arith.constant 0 : index
    %17 = vector.load %arg5[%c0_10, %c0_11] : memref<128x64xbf16, #tpu.memory_space<vmem>>, vector<128x64xbf16>
    %cst_12 = arith.constant dense<0.000000e+00> : vector<16x64xf32>
    %18 = tpu.matmul %15, %17, %cst_12 {dimension_numbers = #tpu.dot_dimension_numbers<[1], [0], [0], [1], [0, 0, 1, 1], [], []>} : vector<16x128xbf16>, vector<128x64xbf16>, vector<16x64xf32> -> vector<16x64xf32>
    %19 = arith.addf %16, %18 : vector<16x64xf32>
    %c0_13 = arith.constant 0 : index
    %c0_14 = arith.constant 0 : index
    %20 = vector.load %arg7[%c0_13, %c0_14] : memref<16x64xf32, #tpu.memory_space<vmem>>, vector<16x64xf32>
    tpu.vector_store %arg7[%c0_13, %c0_14], %19 {strides = array<i32>} : memref<16x64xf32, #tpu.memory_space<vmem>>, vector<16x64xf32>,
    %c0_i32_15 = arith.constant 0 : i32
    %21 = arith.cmpi eq, %arg1, %c0_i32_15 : i32
    %22 = arith.extui %21 : i1 to i32
    %c0_i32_16 = arith.constant 0 : i32
    %23 = arith.cmpi ne, %22, %c0_i32_16 : i32
    scf.if %23 {
      %c0_17 = arith.constant 0 : index
      %c0_18 = arith.constant 0 : index
      %24 = vector.load %arg7[%c0_17, %c0_18] : memref<16x64xf32, #tpu.memory_space<vmem>>, vector<16x64xf32>
      %c0_19 = arith.constant 0 : index
      %c0_20 = arith.constant 0 : index
      %25 = vector.load %arg6[%c0_19, %c0_20] : memref<16x64xf32, #tpu.memory_space<vmem>>, vector<16x64xf32>
      tpu.vector_store %arg6[%c0_19, %c0_20], %24 {strides = array<i32>} : memref<16x64xf32, #tpu.memory_space<vmem>>, vector<16x64xf32>,
    } else {
    }
    return
  }
  func.func @transform_0(%arg0: i32, %arg1: i32) -> (i32, i32) {
    %c0_i32 = arith.constant 0 : i32
    %c0_i32_0 = arith.constant 0 : i32
    return %arg0, %c0_i32 : i32, i32
  }
  func.func @transform_1(%arg0: i32, %arg1: i32) -> (i32, i32) {
    %c0_i32 = arith.constant 0 : i32
    %c0_i32_0 = arith.constant 0 : i32
    return %c0_i32, %arg1 : i32, i32
  }
  func.func @transform_2(%arg0: i32, %arg1: i32) -> (i32, i32) {
    %c0_i32 = arith.constant 0 : i32
    %c0_i32_0 = arith.constant 0 : i32
    return %c0_i32, %arg1 : i32, i32
  }
  func.func @transform_3(%arg0: i32, %arg1: i32) -> (i32, i32) {
    %c0_i32 = arith.constant 0 : i32
    %c0_i32_0 = arith.constant 0 : i32
    return %arg1, %c0_i32 : i32, i32
  }
  func.func @transform_4(%arg0: i32, %arg1: i32) -> (i32, i32) {
    %c0_i32 = arith.constant 0 : i32
    %c0_i32_0 = arith.constant 0 : i32
    return %arg0, %c0_i32 : i32, i32
  }
}

</mosaic_0001>

<bundles_post_ra>
// kernel: tpu_custom_call.1
= control target key start
LH: loop header
LB: loop body
LE: loop exit
PB: predicated region body
PF: predicated region fallthrough
CT: control target
= control target key end

     0   :  { %v472_v1 = vmov 0.0   ;;  %vm473_vm0 = vmmov 0   ;;  %vm23_vm1 = vcmask 523264   ;;  %s576_s0 = inlined_call_operand.vmem [shape: bf16[16,64], index: 0, kind: input, shape index: {}]   ;;  %s577_s1 = inlined_call_operand.vmem [shape: bf16[64,128], index: 1, kind: input, shape index: {}]   ;;  %s578_s2 = inlined_call_operand.vmem [shape: bf16[64,128], index: 2, kind: input, shape index: {}]   ;;  %s579_s3 = inlined_call_operand.vmem [shape: bf16[128,64], index: 3, kind: input, shape index: {}]   ;;  %s580_s4 = inlined_call_operand.hbm [shape: f32[16,64], index: 4, kind: output, shape index: {}]  }
   0x1   :  { %v423_v0 = vld [vmem:[%s577_s1] sm:$0xff]   ;;  %374 = vmatprep.subr.bf16.mxu1 %v472_v1  ;;  %398 = vmatprep.subr.bf16.mxu0 %v472_v1  ;;  %v424_v2 = vld [vmem:[%s577_s1 + $0x8] sm:$0xff]   ;;  %24 = vst.msk [vmem:[#allocation2] sm:$0xff] %vm23_vm1, %v472_v1  ;;  %25 = vst.msk [vmem:[#allocation2 + $0x8] sm:$0xff] %vm23_vm1, %v472_v1 }
   0x2   :  { %375 = vmatpush3.bf16.msra.mxu1 %v423_v0  ;;  %382 = vmatprep.mubr.msk.bf16.mxu1 %vm473_vm0, %v472_v1  ;;  %v425_v3 = vld [vmem:[%s577_s1 + $0x10] sm:$0xff]   ;;  %v426_v4 = vld [vmem:[%s577_s1 + $0x18] sm:$0xff]   ;;  %v427_v5 = vld [vmem:[%s576_s0] sm:$0xff]  }
   0x3   :  { %376 = vmatprep.subr.bf16.mxu1 %v472_v1  ;;  %414 = vmatprep.mubr.msk.bf16.mxu0 %vm473_vm0, %v472_v1  ;;  %v428_v6 = vld [vmem:[%s578_s2] sm:$0xff]  }
   0x6   :  { %377 = vmatpush3.bf16.msra.mxu1 %v424_v2 }
   0x7   :  { %378 = vmatprep.subr.bf16.mxu1 %v472_v1 }
   0xa   :  { %379 = vmatpush3.bf16.msra.mxu1 %v425_v3 }
   0xb   :  { %380 = vmatprep.subr.bf16.mxu1 %v472_v1 }
   0xe   :  { %381 = vmatpush3.bf16.msra.mxu1 %v426_v4 }
   0xf   :  { %9 = vsyncpa [#allocation4], 0  ;;  %386 = vmatprep.subr.bf16.mxu1 %v472_v1  ;;  %v429_v7 = vld [vmem:[%s578_s2 + $0x8] sm:$0xff]   ;;  %v430_v8 = vld [vmem:[%s578_s2 + $0x10] sm:$0xff]  }
  0x10   :  { %v431_v9 = vld [vmem:[%s578_s2 + $0x18] sm:$0xff]   ;;  %v432_v10 = vld [vmem:[%s579_s3] sm:$0xff]   ;;  %v433_v11 = vld [vmem:[%s579_s3 + $0x8] sm:$0xff]  }
  0x11   :  { %383 = vmatmul.mubr.msk.bf16.vlgmr.msra.gmra.mrb[0].mxu1 %vm23_vm1, %v427_v5  ;;  %399 = vmatpush3.bf16.msra.mxu0 %v432_v10  ;;  %v434_v12 = vld [vmem:[%s579_s3 + $0x10] sm:$0xff]   ;;  %v435_v13 = vld [vmem:[%s579_s3 + $0x18] sm:$0xff]   ;;  %v436_v14 = vld [vmem:[%s579_s3 + $0x20] sm:$0xff]  }
  0x12   :  { %387 = vmatpush3.bf16.msra.mxu1 %v428_v6  ;;  %394 = vmatprep.mubr.msk.bf16.mxu1 %vm473_vm0, %v472_v1  ;;  %v437_v15 = vld [vmem:[%s579_s3 + $0x28] sm:$0xff]   ;;  %v438_v16 = vld [vmem:[%s579_s3 + $0x30] sm:$0xff]   ;;  %v439_v17 = vld [vmem:[%s579_s3 + $0x38] sm:$0xff]   ;;  %s474_s3 = smov [#allocation3]  }
  0x13   :  { %388 = vmatprep.subr.bf16.mxu1 %v472_v1  ;;  %400 = vmatprep.subr.bf16.mxu0 %v472_v1  ;;  %v200_v39 = vld [vmem:[#allocation2] sm:$0xff]  ;;  %v201_v41 = vld [vmem:[#allocation2 + $0x8] sm:$0xff]  ;;  %s323_s20 = sshll.u32 %s474_s3, 4  ;;  %s324_s20 = int_to_ptr.vmem [resolvable:$true] %s323_s20 }
  0x14   :  { %s448_s21 = scalar_lea.vmem %s324_s20, 256  ;;  %p453_p1 = scmp.lt.s32.totalorder %s324_s20, %s324_s20 }
  0x15   :  { %401 = vmatpush3.bf16.msra.mxu0 %v433_v11  ;;  %p449_p0 = scmp.ne.s32.totalorder %s324_s20, %s448_s21  ;;  %p454_p2 = scmp.lt.s32.totalorder %s448_s21, %s448_s21 }
  0x16   :  { %389 = vmatpush3.bf16.msra.mxu1 %v429_v7  ;;  %402 = vmatprep.subr.bf16.mxu0 %v472_v1 }
  0x17   :  { %390 = vmatprep.subr.bf16.mxu1 %v472_v1  ;;  %p455_p3 = por %p454_p2, %p453_p1 }
  0x19   :  { %403 = vmatpush3.bf16.msra.mxu0 %v434_v12  ;;  %p456_p4 = pnand %p455_p3, %p449_p0 }
  0x1a   :  { %391 = vmatpush3.bf16.msra.mxu1 %v430_v8  ;;  %404 = vmatprep.subr.bf16.mxu0 %v472_v1 }
  0x1b   :  { %392 = vmatprep.subr.bf16.mxu1 %v472_v1 }
  0x1d   :  { %405 = vmatpush3.bf16.msra.mxu0 %v435_v13 }
  0x1e   :  { %393 = vmatpush3.bf16.msra.mxu1 %v431_v9  ;;  %406 = vmatprep.subr.bf16.mxu0 %v472_v1 }
  0x21   :  { %395 = vmatmul.mubr.msk.bf16.vlgmr.msra.gmra.mrb[4].mxu1 %vm23_vm1, %v427_v5  ;;  %407 = vmatpush3.bf16.msra.mxu0 %v436_v14 }
  0x22   :  { %408 = vmatprep.subr.bf16.mxu0 %v472_v1 }
  0x25   :  { %409 = vmatpush3.bf16.msra.mxu0 %v437_v15 }
  0x26   :  { %410 = vmatprep.subr.bf16.mxu0 %v472_v1 }
  0x29   :  { %411 = vmatpush3.bf16.msra.mxu0 %v438_v16 }
  0x2a   :  { %412 = vmatprep.subr.bf16.mxu0 %v472_v1 }
  0x2d   :  { %413 = vmatpush3.bf16.msra.mxu0 %v439_v17 }
  0xe4   :  { %v103_v18 = vpop.f32.mrb[0].mxu1 }
  0xe5   :  { %v345_v19 = vmul.f32 -1.442695, %v103_v18  ;;  %v384_v20 = vpop.f32.mrb[1].mxu1 }
  0xe6   :  { %v106_v21 = vpop.f32.mrb[2].mxu1 }
  0xe7   :  { %440 = vpow2.f32 %v345_v19  ;;  %v346_v22 = vmul.f32 -1.442695, %v106_v21  ;;  %v385_v23 = vpop.f32.mrb[3].mxu1 }
  0xe9   :  { %442 = vpow2.f32 %v346_v22 }
  0xf1   :  { %v441_v24 = vpop.eup %440 }
  0xf2   :  { %v189_v25 = vadd.f32 1.0, %v441_v24 }
  0xf3   :  { %v443_v26 = vpop.eup %442 }
  0xf4   :  { %444 = vrcp.f32 %v189_v25  ;;  %v190_v27 = vadd.f32 1.0, %v443_v26  ;;  %v176_v28 = vpop.f32.mrb[4].mxu1 }
  0xf5   :  { %v396_v29 = vpop.f32.mrb[5].mxu1 }
  0xf6   :  { %446 = vrcp.f32 %v190_v27  ;;  %v179_v30 = vpop.f32.mrb[6].mxu1 }
  0xf7   :  { %v397_v31 = vpop.f32.mrb[7].mxu1 }
  0xfe   :  { %v445_v32 = vpop.eup %444 }
  0xff   :  { %v195_v33 = vmul.f32 %v445_v32, %v103_v18 }
 0x100   :  { %v447_v34 = vpop.eup %446 }
 0x101   :  { %v196_v35 = vmul.f32 %v447_v34, %v106_v21  ;;  %v197_v36 = vmul.f32 %v195_v33, %v176_v28 }
 0x103   :  { %v198_v37 = vmul.f32 %v196_v35, %v179_v30 }
 0x105   :  { %v199_v38 = vpack.c.bf16 %v198_v37, %v197_v36 }
 0x107   :  { %415 = vmatmul.mubr.bf16.vlgmr.msra.gmra.mrb[0].mxu0 %v199_v38 }
 0x1da   :  { %v300_v40 = vpop.f32.mrb[0].mxu0 }
 0x1db   :  { %v307_v42 = vadd.f32 %v300_v40, %v200_v39  ;;  %v416_v43 = vpop.f32.mrb[1].mxu0 }
 0x1dc   :  { %v303_v44 = vpop.f32.mrb[2].mxu0 }
 0x1dd   :  { %309 = vst.msk [vmem:[#allocation2] sm:$0xff] %vm23_vm1, %v307_v42  ;;  %v308_v45 = vadd.f32 %v303_v44, %v201_v41  ;;  %v417_v46 = vpop.f32.mrb[3].mxu0 }
 0x1df   :  { %310 = vst.msk [vmem:[#allocation2 + $0x8] sm:$0xff] %vm23_vm1, %v308_v45 }
 0x1e4   :  { %v314_v47 = vld [vmem:[#allocation2] sm:$0xff] }
 0x1e5   :  { %316 = vst.msk [vmem:[#allocation3] sm:$0xff] %vm23_vm1, %v314_v47 }
 0x1e6   :  { %v315_v48 = vld [vmem:[#allocation2 + $0x8] sm:$0xff] }
 0x1e7   :  { %317 = vst.msk [vmem:[#allocation3 + $0x8] sm:$0xff] %vm23_vm1, %v315_v48 }
 0x1e8   :  { %459 = shalt.err (!%p456_p4)
}
 0x1e9   :  { %s460_s24 = scalar_lea.hbm %s580_s4, 256 }
 0x1ea   :  { %p461_p5 = scmp.ne.s32.totalorder %s580_s4, %s460_s24  ;;  %p464_p6 = scmp.lt.u32.totalorder %s460_s24, %s580_s4 }
 0x1ec   :  { %p466_p7 = pnand %p464_p6, %p461_p5 }
 0x1ee   :  { %469 = shalt.err (!%p466_p7)
}
 0x1ef   :  { %s475_s1 = smov 128   ;;  %s476_s0 = smov 8  }
 0x1f0   :  { %329 = dma.vmem_to_hbm [thread:$0]  %s324_s20, 256, %s580_s4, [#allocation4], %s475_s1, %s475_s1, %s476_s0  }
 0x1f1   :  { %470 = dma.done.wait [#allocation4], 256  }
 0x1f2   :  { %471 = vsyncadd [#allocation4], 4294967040 }
 0x1f3   :  { %333 = vsyncpa [#allocation4], 1 }

</bundles_post_ra>
